<compile_context>
chip_gen: v6e
topology: v6e:2x2x1
jax: 0.10.0
libtpu: 0.0.40
codegen_flags: <defaults>
</compile_context>

<pallas_src>
import functools

import jax
import jax.numpy as jnp
import numpy as np
from jax.experimental import pallas as pl
from jax.experimental.pallas import tpu as pltpu


# --------------------------------------------------------------------------
# Kernel 1: v_head projection — tiled MXU mat-vec with f32 accumulation.
# --------------------------------------------------------------------------
def vhead_matvec_kernel(x_ref, w_ref, out_ref, acc_ref):
    k = pl.program_id(1)

    @pl.when(k == 0)
    def _init():
        acc_ref[...] = jnp.zeros_like(acc_ref)

    # (tm, th) @ (th, 1) -> (tm, 1), bf16 (or native dtype) in, f32 accumulate.
    acc_ref[...] += jnp.dot(x_ref[...], w_ref[...],
                            preferred_element_type=jnp.float32)

    @pl.when(k == pl.num_programs(1) - 1)
    def _finalize():
        out_ref[...] = acc_ref[...]


def _pick_tile(dim, candidates):
    for c in candidates:
        if c <= dim and dim % c == 0:
            return c
    return dim


def _vhead_rewards(hidden_states, v_head_w):
    """rewards[b, s] = hidden_states[b, s, :] . v_head_w[0, :]   (f32)."""
    B, S, H = hidden_states.shape
    M = B * S
    # Merging leading dims is a metadata-only reshape on the host side.
    x2d = hidden_states.reshape(M, H)
    w_col = v_head_w.reshape(H, 1).astype(hidden_states.dtype)

    tm = _pick_tile(M, (1024, 512, 256, 128, 64, 32, 16, 8))
    th = _pick_tile(H, (512, 256, 128))

    itemsize = jnp.dtype(hidden_states.dtype).itemsize
    # Explicit scoped-VMEM budget sized to the (double-buffered) block,
    # clamped so it stays safe on v7x's smaller (64 MiB) VMEM.
    vmem_limit = int(min(max(6 * tm * th * itemsize + (8 << 20), 16 << 20),
                         48 << 20))

    rewards_2d = pl.pallas_call(
        vhead_matvec_kernel,
        out_shape=jax.ShapeDtypeStruct((M, 1), jnp.float32),
        grid_spec=pltpu.PrefetchScalarGridSpec(
            num_scalar_prefetch=0,
            grid=(M // tm, H // th),
            in_specs=[
                pl.BlockSpec((tm, th), lambda i, k: (i, k)),
                pl.BlockSpec((th, 1), lambda i, k: (k, 0)),
            ],
            out_specs=pl.BlockSpec((tm, 1), lambda i, k: (i, 0)),
            scratch_shapes=[pltpu.VMEM((tm, 1), jnp.float32)],
        ),
        compiler_params=pltpu.CompilerParams(
            dimension_semantics=("parallel", "arbitrary"),
            vmem_limit_bytes=vmem_limit,
        ),
    )(x2d, w_col)
    return rewards_2d.reshape(B, S)


# --------------------------------------------------------------------------
# Kernel 2: epilogue — pad index, divergence, truncated logsigmoid loss,
#           chosen/rejected end scores.  O(B*S), runs once.
# --------------------------------------------------------------------------
def reward_epilogue_kernel(chosen_ids_ref, rejected_ids_ref, rewards_ref,
                           loss_ref, c_score_ref, r_score_ref,
                           *, pad_id, num_padding_at_beginning):
    chosen_ids = chosen_ids_ref[...]                    # (bs, S) int32
    rejected_ids = rejected_ids_ref[...]                # (bs, S) int32
    bs, S = chosen_ids.shape

    rewards = rewards_ref[...]                          # (2*bs, S) f32
    chosen_rewards = rewards[:bs]
    rejected_rewards = rewards[bs:]

    iota_s = jax.lax.broadcasted_iota(jnp.int32, (bs, S), 1)
    k = num_padding_at_beginning

    def kth_pad_index(ids):
        # Index of the (k+1)-th pad token, or S if there are fewer pads.
        # k is a small compile-time constant -> (k+1) masked min-reductions.
        remaining = ids == pad_id
        idx = jnp.full((bs, 1), S, dtype=jnp.int32)
        for _ in range(k + 1):
            idx = jnp.min(jnp.where(remaining, iota_s, S), axis=1, keepdims=True)
            remaining = remaining & (iota_s > idx)
        return idx                                       # (bs, 1)

    c_ind = kth_pad_index(chosen_ids)
    r_ind_pad = kth_pad_index(rejected_ids)

    div = chosen_ids != rejected_ids
    has_div = jnp.max(div.astype(jnp.int32), axis=1, keepdims=True) > 0
    first_div = jnp.min(jnp.where(div, iota_s, S), axis=1, keepdims=True)

    end_ind = jnp.where(has_div, jnp.maximum(c_ind, r_ind_pad), S)
    divergence_ind = jnp.where(has_div, first_div, S - 1)
    r_ind = jnp.where(has_div, r_ind_pad, c_ind)

    # -logsigmoid(c - r) averaged over the truncated window [divergence, end)
    trunc_mask = (iota_s >= divergence_ind) & (iota_s < end_ind)
    diff = chosen_rewards - rejected_rewards
    logsig = jnp.where(diff >= 0,
                       -jnp.log1p(jnp.exp(-diff)),
                       diff - jnp.log1p(jnp.exp(diff)))  # stable logsigmoid
    mask_f = trunc_mask.astype(jnp.float32)
    count = jnp.sum(mask_f, axis=1, keepdims=True)
    per_pair = -(jnp.sum(mask_f * logsig, axis=1, keepdims=True) / count)
    loss_ref[...] = jnp.sum(per_pair, axis=0, keepdims=True) / float(bs)

    # end scores: chosen_reward[c_ind - 1], rejected_reward[r_ind - 1]
    c_sel = (iota_s == (c_ind - 1)).astype(jnp.float32)
    r_sel = (iota_s == (r_ind - 1)).astype(jnp.float32)
    c_score_ref[...] = jnp.sum(c_sel * chosen_rewards, axis=1, keepdims=True)
    r_score_ref[...] = jnp.sum(r_sel * rejected_rewards, axis=1, keepdims=True)


def reward_model_forward(input_ids, hidden_states, v_head_w,
                         pad_id, num_padding_at_beginning=0):
    """Pallas version of RewardModel.forward given transformer hidden states."""
    B, S = input_ids.shape
    assert B % 2 == 0
    bs = B // 2

    chosen_ids = input_ids[:bs].astype(jnp.int32)
    rejected_ids = input_ids[bs:].astype(jnp.int32)

    # --- heavy part: v_head projection, streamed through the MXU ---
    rewards = _vhead_rewards(hidden_states, v_head_w)    # (B, S) f32

    # --- tiny epilogue: single grid step over (B, S) ---
    kernel = functools.partial(
        reward_epilogue_kernel, pad_id=pad_id,
        num_padding_at_beginning=num_padding_at_beginning)

    loss, c_scores, r_scores = pl.pallas_call(
        kernel,
        out_shape=(
            jax.ShapeDtypeStruct((1, 1), jnp.float32),
            jax.ShapeDtypeStruct((bs, 1), jnp.float32),
            jax.ShapeDtypeStruct((bs, 1), jnp.float32),
        ),
        grid=(1,),
        in_specs=[
            pl.BlockSpec((bs, S), lambda i: (0, 0)),
            pl.BlockSpec((bs, S), lambda i: (0, 0)),
            pl.BlockSpec((B, S), lambda i: (0, 0)),
        ],
        out_specs=(
            pl.BlockSpec((1, 1), lambda i: (0, 0)),
            pl.BlockSpec((bs, 1), lambda i: (0, 0)),
            pl.BlockSpec((bs, 1), lambda i: (0, 0)),
        ),
        compiler_params=pltpu.CompilerParams(
            dimension_semantics=("arbitrary",)),
    )(chosen_ids, rejected_ids, rewards)

    return {
        'loss': loss[0, 0],
        'chosen_mean_scores': c_scores[:, 0],
        'rejected_mean_scores': r_scores[:, 0],
    }


# ----------------------------- pure-numpy reference (mirrors the torch code)
def _log_sigmoid_np(x):
    return np.where(x >= 0, -np.log1p(np.exp(-x)), x - np.log1p(np.exp(x)))


def reference_forward(input_ids, hidden_states_f32, v_head_w_f32,
                      pad_id, num_pad_begin):
    ids = np.asarray(input_ids)
    h = np.asarray(hidden_states_f32, dtype=np.float32)
    w = np.asarray(v_head_w_f32, dtype=np.float32)
    rewards = h @ w[0]                                   # (B, S)
    B, S = ids.shape
    bs = B // 2
    loss = 0.0
    c_scores, r_scores = [], []
    for i in range(bs):
        cid, rid = ids[i], ids[bs + i]
        cr, rr = rewards[i], rewards[bs + i]
        c_inds = np.nonzero(cid == pad_id)[0]
        c_ind = int(c_inds[num_pad_begin]) if len(c_inds) > num_pad_begin else S
        divs = np.nonzero(cid != rid)[0]
        if len(divs) == 0:
            end_ind = S
            divergence_ind = S - 1
            r_ind = c_ind
        else:
            r_inds = np.nonzero(rid == pad_id)[0]
            r_ind = int(r_inds[num_pad_begin]) if len(r_inds) > num_pad_begin else S
            end_ind = max(c_ind, r_ind)
            divergence_ind = int(divs[0])
        c_scores.append(cr[c_ind - 1])
        r_scores.append(rr[r_ind - 1])
        loss += -np.mean(
            _log_sigmoid_np(cr[divergence_ind:end_ind] - rr[divergence_ind:end_ind]))
    return loss / bs, np.array(c_scores), np.array(r_scores)


if __name__ == "__main__":
    key = jax.random.PRNGKey(0)
    bs, S, H, vocab = 2, 16, 32, 64
    B = 2 * bs
    PAD_ID = 0
    NUM_PAD_AT_BEGIN = 0

    k_emb, k_w = jax.random.split(key)
    # bf16 hidden states (model-native dtype) -> kernel reads bf16, accumulates f32.
    emb_table = (jax.random.normal(k_emb, (vocab, H), dtype=jnp.float32) * 0.5
                 ).astype(jnp.bfloat16)
    # v_head = nn.Linear(H, 1, bias=False)  -> weight shape (1, H)
    v_head_w = jax.random.normal(k_w, (1, H), dtype=jnp.float32) / jnp.sqrt(float(H))

    chosen = jnp.array([
        [5, 6, 7, 8, 9, 10, 11, 12, 0, 0, 0, 0, 0, 0, 0, 0],
        [3, 4, 5, 6, 7, 8, 9, 10, 11, 12, 13, 14, 15, 16, 17, 18],
    ], dtype=jnp.int32)
    rejected = jnp.array([
        [5, 6, 7, 8, 13, 14, 15, 16, 17, 0, 0, 0, 0, 0, 0, 0],
        [3, 4, 5, 20, 21, 0, 0, 0, 0, 0, 0, 0, 0, 0, 0, 0],
    ], dtype=jnp.int32)
    input_ids = jnp.concatenate([chosen, rejected], axis=0)       # (4, 16)

    # TODO(synk): the base transformer backbone (self.rwtranrsformer) has no clean
    # single-kernel Pallas equivalent; hidden_states come from a deterministic stub
    # embedding lookup standing in for transformer_outputs[0].
    hidden_states = emb_table[input_ids]                          # (B, S, H) bf16

    out = reward_model_forward(input_ids, hidden_states, v_head_w,
                               PAD_ID, NUM_PAD_AT_BEGIN)
    jax.block_until_ready(out)

    # Reference uses the exact bf16-rounded values the kernel sees.
    h_ref = np.asarray(hidden_states.astype(jnp.float32))
    w_ref = np.asarray(v_head_w.astype(hidden_states.dtype).astype(jnp.float32))
    ref_loss, ref_c, ref_r = reference_forward(
        input_ids, h_ref, w_ref, PAD_ID, NUM_PAD_AT_BEGIN)

    np.testing.assert_allclose(np.asarray(out['loss']), ref_loss,
                               rtol=1e-4, atol=1e-4)
    np.testing.assert_allclose(np.asarray(out['chosen_mean_scores']), ref_c,
                               rtol=1e-4, atol=1e-4)
    np.testing.assert_allclose(np.asarray(out['rejected_mean_scores']), ref_r,
                               rtol=1e-4, atol=1e-4)
    print("KERNEL_OK")
</pallas_src>

<mosaic_0001>
module attributes {stable_mosaic.version = 11 : i64} {
  func.func @vhead_matvec_kernel(%arg0: i32, %arg1: i32, %arg2: memref<64x32xbf16, #tpu.memory_space<vmem>>, %arg3: memref<32x1xbf16, #tpu.memory_space<vmem>>, %arg4: memref<64x1xf32, #tpu.memory_space<vmem>>, %arg5: memref<64x1xf32, #tpu.memory_space<vmem>>) attributes {dimension_semantics = [#tpu.dimension_semantics<parallel>, #tpu.dimension_semantics<arbitrary>], iteration_bounds = array<i64: 1, 1>, scalar_prefetch = 0 : i64, scratch_operands = 1 : i64, tpu.core_type = #tpu.core_type<tc>, window_params = [{transform_indices = @transform_0, window_bounds = array<i64: 64, 32>}, {transform_indices = @transform_1, window_bounds = array<i64: 32, 1>}, {transform_indices = @transform_2, window_bounds = array<i64: 64, 1>}]} {
    %c0_i32 = arith.constant 0 : i32
    %0 = arith.cmpi eq, %arg1, %c0_i32 : i32
    %1 = arith.extui %0 : i1 to i32
    %c0_i32_0 = arith.constant 0 : i32
    %2 = arith.cmpi ne, %1, %c0_i32_0 : i32
    scf.if %2 {
      %cst_10 = arith.constant 0.000000e+00 : f32
      %12 = vector.broadcast %cst_10 : f32 to vector<64x1xf32>
      %c0_11 = arith.constant 0 : index
      %c0_12 = arith.constant 0 : index
      %13 = vector.load %arg5[%c0_11, %c0_12] : memref<64x1xf32, #tpu.memory_space<vmem>>, vector<64x1xf32>
      tpu.vector_store %arg5[%c0_11, %c0_12], %12 {strides = array<i32>} : memref<64x1xf32, #tpu.memory_space<vmem>>, vector<64x1xf32>,
    } else {
    }
    %c0 = arith.constant 0 : index
    %c0_1 = arith.constant 0 : index
    %3 = vector.load %arg5[%c0, %c0_1] : memref<64x1xf32, #tpu.memory_space<vmem>>, vector<64x1xf32>
    %c0_2 = arith.constant 0 : index
    %c0_3 = arith.constant 0 : index
    %4 = vector.load %arg2[%c0_2, %c0_3] : memref<64x32xbf16, #tpu.memory_space<vmem>>, vector<64x32xbf16>
    %c0_4 = arith.constant 0 : index
    %c0_5 = arith.constant 0 : index
    %5 = vector.load %arg3[%c0_4, %c0_5] : memref<32x1xbf16, #tpu.memory_space<vmem>>, vector<32x1xbf16>
    %cst = arith.constant dense<0.000000e+00> : vector<64x1xf32>
    %6 = tpu.matmul %4, %5, %cst {dimension_numbers = #tpu.dot_dimension_numbers<[1], [0], [0], [1], [0, 0, 1, 1], [], []>} : vector<64x32xbf16>, vector<32x1xbf16>, vector<64x1xf32> -> vector<64x1xf32>
    %7 = arith.addf %3, %6 : vector<64x1xf32>
    %c0_6 = arith.constant 0 : index
    %c0_7 = arith.constant 0 : index
    %8 = vector.load %arg5[%c0_6, %c0_7] : memref<64x1xf32, #tpu.memory_space<vmem>>, vector<64x1xf32>
    tpu.vector_store %arg5[%c0_6, %c0_7], %7 {strides = array<i32>} : memref<64x1xf32, #tpu.memory_space<vmem>>, vector<64x1xf32>,
    %c0_i32_8 = arith.constant 0 : i32
    %9 = arith.cmpi eq, %arg1, %c0_i32_8 : i32
    %10 = arith.extui %9 : i1 to i32
    %c0_i32_9 = arith.constant 0 : i32
    %11 = arith.cmpi ne, %10, %c0_i32_9 : i32
    scf.if %11 {
      %c0_10 = arith.constant 0 : index
      %c0_11 = arith.constant 0 : index
      %12 = vector.load %arg5[%c0_10, %c0_11] : memref<64x1xf32, #tpu.memory_space<vmem>>, vector<64x1xf32>
      %c0_12 = arith.constant 0 : index
      %c0_13 = arith.constant 0 : index
      %13 = vector.load %arg4[%c0_12, %c0_13] : memref<64x1xf32, #tpu.memory_space<vmem>>, vector<64x1xf32>
      tpu.vector_store %arg4[%c0_12, %c0_13], %12 {strides = array<i32>} : memref<64x1xf32, #tpu.memory_space<vmem>>, vector<64x1xf32>,
    } else {
    }
    return
  }
  func.func @transform_0(%arg0: i32, %arg1: i32) -> (i32, i32) {
    %c0_i32 = arith.constant 0 : i32
    return %arg0, %arg1 : i32, i32
  }
  func.func @transform_1(%arg0: i32, %arg1: i32) -> (i32, i32) {
    %c0_i32 = arith.constant 0 : i32
    %c0_i32_0 = arith.constant 0 : i32
    return %arg1, %c0_i32 : i32, i32
  }
  func.func @transform_2(%arg0: i32, %arg1: i32) -> (i32, i32) {
    %c0_i32 = arith.constant 0 : i32
    %c0_i32_0 = arith.constant 0 : i32
    return %arg0, %c0_i32 : i32, i32
  }
}

</mosaic_0001>

<bundles_post_ra>
// kernel: tpu_custom_call.1
= control target key start
LH: loop header
LB: loop body
LE: loop exit
PB: predicated region body
PF: predicated region fallthrough
CT: control target
= control target key end

     0   :  { %vm16_vm0 = vcmask 7168   ;;  %v234_v1 = vmov 0.0   ;;  %vm77_vm1 = vcmask 261120   ;;  %s316_s1 = inlined_call_operand.vmem [shape: bf16[32,1], index: 1, kind: input, shape index: {}]   ;;  %s317_s0 = inlined_call_operand.vmem [shape: bf16[64,32], index: 0, kind: input, shape index: {}]   ;;  %s318_s2 = inlined_call_operand.vmem [shape: f32[64,1], index: 2, kind: output, shape index: {}]  }
   0x1   :  { %v228_v0 = vld [vmem:[%s316_s1 + $0x8] sm:$0xff]   ;;  %19 = vst.msk [vmem:[#allocation2 + $0x10] sm:$0xff] %vm16_vm0, %v234_v1  ;;  %17 = vst.msk [vmem:[#allocation2] sm:$0xff] %vm16_vm0, %v234_v1  ;;  %v229_v2 = vld [vmem:[%s316_s1] sm:$0xff]  }
   0x2   :  { %18 = vst.msk [vmem:[#allocation2 + $0x8] sm:$0xff] %vm16_vm0, %v234_v1  ;;  %20 = vst.msk [vmem:[#allocation2 + $0x18] sm:$0xff] %vm16_vm0, %v234_v1  ;;  %211 = vmatprep.subr.bf16.mxu0 %v228_v0  ;;  %223 = vmatprep.subr.bf16.mxu1 %v228_v0  ;;  %v230_v3 = vld [vmem:[%s317_s0] sm:$0xff]   ;;  %v231_v4 = vld [vmem:[%s317_s0 + $0x10] sm:$0xff]  }
   0x3   :  { %21 = vst.msk [vmem:[#allocation2 + $0x20] sm:$0xff] %vm16_vm0, %v234_v1  ;;  %22 = vst.msk [vmem:[#allocation2 + $0x28] sm:$0xff] %vm16_vm0, %v234_v1  ;;  %212 = vmatpush3.bf16.msra.mxu0 %v228_v0  ;;  %225 = vmatpush3.bf16.msra.mxu1 %v228_v0  ;;  %v232_v5 = vld [vmem:[%s317_s0 + $0x8] sm:$0xff]   ;;  %v233_v6 = vld [vmem:[%s317_s0 + $0x18] sm:$0xff]  }
   0x4   :  { %23 = vst.msk [vmem:[#allocation2 + $0x30] sm:$0xff] %vm16_vm0, %v234_v1  ;;  %24 = vst.msk [vmem:[#allocation2 + $0x38] sm:$0xff] %vm16_vm0, %v234_v1  ;;  %213 = vmatprep.subr.bf16.mxu0 %v229_v2  ;;  %224 = vmatprep.subr.bf16.mxu1 %v229_v2 }
   0x5   :  { %215 = vmatprep.mubr.msk.bf16.mxu0 %vm77_vm1, %v230_v3  ;;  %219 = vmatprep.mubr.msk.bf16.mxu1 %vm77_vm1, %v231_v4 }
   0x7   :  { %214 = vmatpush3.bf16.msra.mxu0 %v229_v2  ;;  %226 = vmatpush3.bf16.msra.mxu1 %v229_v2 }
   0x8   :  { %v27_v7 = vld [vmem:[#allocation2 + $0x10] sm:$0xff]  ;;  %v25_v11 = vld [vmem:[#allocation2] sm:$0xff] }
   0x9   :  { %v28_v17 = vld [vmem:[#allocation2 + $0x18] sm:$0xff]  ;;  %v26_v23 = vld [vmem:[#allocation2 + $0x8] sm:$0xff] }
   0xa   :  { %216 = vmatmul.mubr.msk.bf16.vlgmr.msra.gmra.mxu0 %vm77_vm1, %v232_v5  ;;  %220 = vmatmul.mubr.msk.bf16.vlgmr.msra.gmra.mxu1 %vm77_vm1, %v233_v6  ;;  %v29_v12 = vld [vmem:[#allocation2 + $0x20] sm:$0xff]  ;;  %v30_v24 = vld [vmem:[#allocation2 + $0x28] sm:$0xff] }
   0xb   :  { %v31_v8 = vld [vmem:[#allocation2 + $0x30] sm:$0xff]  ;;  %v32_v18 = vld [vmem:[#allocation2 + $0x38] sm:$0xff] }
  0xca   :  { %v217_v9 = vpop.f32.mrf.mxu0  ;;  %v221_v10 = vpop.f32.mrf.mxu1 }
  0xcb   :  { %v157_v13 = vadd.f32 %v217_v9, %v27_v7  ;;  %v161_v14 = vadd.f32 %v221_v10, %v31_v8 }
  0xcc   :  { %v124_v15 = vpop.f32.mrf.mxu0  ;;  %v140_v16 = vpop.f32.mrf.mxu1 }
  0xcd   :  { %166 = vst.msk [vmem:[#allocation2 + $0x10] sm:$0xff] %vm16_vm0, %v157_v13  ;;  %170 = vst.msk [vmem:[#allocation2 + $0x30] sm:$0xff] %vm16_vm0, %v161_v14  ;;  %v155_v19 = vadd.f32 %v124_v15, %v25_v11  ;;  %v159_v20 = vadd.f32 %v140_v16, %v29_v12 }
  0xce   :  { %v218_v21 = vpop.f32.mrf.mxu0  ;;  %v222_v22 = vpop.f32.mrf.mxu1 }
  0xcf   :  { %164 = vst.msk [vmem:[#allocation2] sm:$0xff] %vm16_vm0, %v155_v19  ;;  %168 = vst.msk [vmem:[#allocation2 + $0x20] sm:$0xff] %vm16_vm0, %v159_v20  ;;  %v158_v25 = vadd.f32 %v218_v21, %v28_v17  ;;  %v162_v26 = vadd.f32 %v222_v22, %v32_v18 }
  0xd0   :  { %v127_v27 = vpop.f32.mrf.mxu0  ;;  %v143_v28 = vpop.f32.mrf.mxu1 }
  0xd1   :  { %167 = vst.msk [vmem:[#allocation2 + $0x18] sm:$0xff] %vm16_vm0, %v158_v25  ;;  %171 = vst.msk [vmem:[#allocation2 + $0x38] sm:$0xff] %vm16_vm0, %v162_v26  ;;  %v156_v29 = vadd.f32 %v127_v27, %v26_v23  ;;  %v160_v30 = vadd.f32 %v143_v28, %v30_v24 }
  0xd3   :  { %165 = vst.msk [vmem:[#allocation2 + $0x8] sm:$0xff] %vm16_vm0, %v156_v29  ;;  %169 = vst.msk [vmem:[#allocation2 + $0x28] sm:$0xff] %vm16_vm0, %v160_v30 }
  0xd4   :  { %v177_v31 = vld [vmem:[#allocation2 + $0x10] sm:$0xff] }
  0xd5   :  { %v181_v32 = vld [vmem:[#allocation2 + $0x30] sm:$0xff]  ;;  %185 = vst.msk [vmem:[%s318_s2 + $0x10] sm:$0xff] %vm16_vm0, %v177_v31 }
  0xd6   :  { %189 = vst.msk [vmem:[%s318_s2 + $0x30] sm:$0xff] %vm16_vm0, %v181_v32  ;;  %v175_v33 = vld [vmem:[#allocation2] sm:$0xff] }
  0xd7   :  { %v179_v34 = vld [vmem:[#allocation2 + $0x20] sm:$0xff]  ;;  %183 = vst.msk [vmem:[%s318_s2] sm:$0xff] %vm16_vm0, %v175_v33 }
  0xd8   :  { %187 = vst.msk [vmem:[%s318_s2 + $0x20] sm:$0xff] %vm16_vm0, %v179_v34  ;;  %v178_v35 = vld [vmem:[#allocation2 + $0x18] sm:$0xff] }
  0xd9   :  { %v182_v36 = vld [vmem:[#allocation2 + $0x38] sm:$0xff]  ;;  %186 = vst.msk [vmem:[%s318_s2 + $0x18] sm:$0xff] %vm16_vm0, %v178_v35 }
  0xda   :  { %190 = vst.msk [vmem:[%s318_s2 + $0x38] sm:$0xff] %vm16_vm0, %v182_v36  ;;  %v176_v37 = vld [vmem:[#allocation2 + $0x8] sm:$0xff] }
  0xdb   :  { %v180_v38 = vld [vmem:[#allocation2 + $0x28] sm:$0xff]  ;;  %184 = vst.msk [vmem:[%s318_s2 + $0x8] sm:$0xff] %vm16_vm0, %v176_v37 }
  0xdc   :  { %188 = vst.msk [vmem:[%s318_s2 + $0x28] sm:$0xff] %vm16_vm0, %v180_v38 }

</bundles_post_ra>
